<compile_context>
chip_gen: v7x
topology: tpu7x:2x2x1
jax: 0.10.0
libtpu: 0.0.40
codegen_flags: <defaults>
</compile_context>

<pallas_src>
import math

import jax
import jax.numpy as jnp
from jax.experimental import pallas as pl
from jax.experimental.pallas import tpu as pltpu

_HALF_LOG_2PI = 0.5 * math.log(2.0 * math.pi)


def _posterior_kernel(y_ref, age_ref, c_ref, eps_ref,
                      w1y_ref, w1c_ref, w1a_ref, b1_ref,
                      w2mu_ref, w2ls_ref, b2mu_ref, b2ls_ref,
                      out_ref):
    """Feature-major (lane = batch) fused MLP head + rsample + Normal log_prob.

    All activations are (features, TB): the batch dimension sits on the lane axis,
    so elementwise / EUP work and the output stores are lane-dense.
    """
    # Hidden layer: h = W_y @ y + W_c @ c + w_age * age + b1   -> (H, TB) f32.
    h = jnp.dot(w1y_ref[...], y_ref[...], preferred_element_type=jnp.float32)
    h = h + jnp.dot(w1c_ref[...], c_ref[...], preferred_element_type=jnp.float32)
    h = h + w1a_ref[...] * age_ref[...]            # (H,1)*(1,TB) broadcast (VPU)
    h = h + b1_ref[...]
    h = jnp.maximum(h, 0.0)                        # ReLU (VPU, f32)
    hb = h.astype(w2mu_ref.dtype)                  # bf16 operands for the MXU

    # Output heads as two separate tiny matmuls -> no lane/sublane slicing needed.
    mu = jnp.dot(w2mu_ref[...], hb, preferred_element_type=jnp.float32) + b2mu_ref[...]
    log_sigma = (jnp.dot(w2ls_ref[...], hb, preferred_element_type=jnp.float32)
                 + b2ls_ref[...])
    sigma = jnp.exp(log_sigma)                     # EUP

    # Reparameterized sample.
    eps = eps_ref[...]
    param = mu + sigma * eps

    # Normal(mu, sigma).log_prob(param); (param - mu)/sigma == eps by construction,
    # so the divide is removed.
    log_prob = -0.5 * eps * eps - log_sigma - _HALF_LOG_2PI

    # Four full-block stores into the 3-D packed slab (no lane-axis concat).
    out_ref[0] = param
    out_ref[1] = mu
    out_ref[2] = sigma
    out_ref[3] = log_prob


class Normal:
    """Minimal stand-in for torch.distributions.Normal (no Pallas equivalent)."""

    def __init__(self, loc, scale):
        self.loc = loc
        self.scale = scale

    def log_prob(self, value):
        z = (value - self.loc) / self.scale
        return -0.5 * z * z - jnp.log(self.scale) - _HALF_LOG_2PI


class PosteriorModel:
    """JAX/Pallas port of PosteriorModel with a concrete synthetic head."""

    def __init__(self, dim_target, dim_param, n_sample, dim_hidden=32, seed=0,
                 max_batch_tile=2048):
        self.dim_target = dim_target
        self.dim_param = dim_param
        self.n_sample = n_sample
        self.dim_hidden = dim_hidden
        # Batch sits on the lane axis: tiles must be a multiple of 128 (or == B).
        assert max_batch_tile % 128 == 0, "batch tile must be a multiple of 128"
        self.max_batch_tile = max_batch_tile

        dt, dp, H = dim_target, dim_param, dim_hidden
        k = jax.random.split(jax.random.PRNGKey(seed), 5)
        # Deterministic synthetic init, stored directly in the transposed
        # (feature-major) layout the kernel consumes. Matmul operands bf16
        # (MXU-native, half the weight DMA bytes); biases stay f32.
        self.w1y_t = (0.1 * jax.random.normal(k[0], (H, dt))).astype(jnp.bfloat16)
        self.w1c_t = (0.1 * jax.random.normal(k[1], (H, dp))).astype(jnp.bfloat16)
        self.w1a = (0.1 * jax.random.normal(k[2], (H, 1))).astype(jnp.float32)
        self.b1 = jnp.zeros((H, 1), jnp.float32)
        self.w2mu_t = (0.1 * jax.random.normal(k[3], (dp, H))).astype(jnp.bfloat16)
        self.w2ls_t = (0.1 * jax.random.normal(k[4], (dp, H))).astype(jnp.bfloat16)
        self.b2mu = jnp.zeros((dp, 1), jnp.float32)
        self.b2ls = jnp.zeros((dp, 1), jnp.float32)

    # ------------------------------------------------------------------ #
    def _batch_tile(self, b):
        if b <= self.max_batch_tile:
            # Give the "parallel" batch axis >= 2 grid steps when possible so both
            # v7x TensorCores are used (no effect on single-TC v5e/v6e).
            if b >= 256 and b % 256 == 0:
                return b // 2
            return b  # block == full batch dim is always layout-legal
        return self.max_batch_tile

    def _run(self, y, age, cond_sample, seed):
        b = y.shape[0]
        dt, dp, H = self.dim_target, self.dim_param, self.dim_hidden

        # Feature-major activation layout (batch on lanes) — layout plumbing only.
        # NOTE: bf16 downcast of y/cond_sample is a documented numerics deviation.
        y_t = y.T.astype(jnp.bfloat16)                 # (dt, B)
        age_t = age.T.astype(jnp.float32)              # (1, B)
        c_t = cond_sample.T.astype(jnp.bfloat16)       # (dp, B)
        # eps generated host-side (in-kernel pltpu PRNG has no interpret lowering).
        eps_t = jax.random.normal(jax.random.PRNGKey(seed), (dp, b), jnp.float32)

        tb = self._batch_tile(b)
        grid = (pl.cdiv(b, tb),)

        act = lambda rows: pl.BlockSpec((rows, tb), lambda i: (0, i))   # batch-tiled
        res = lambda shape: pl.BlockSpec(shape, lambda i: (0, 0))       # resident

        slab = pl.pallas_call(
            _posterior_kernel,
            out_shape=jax.ShapeDtypeStruct((4, dp, b), jnp.float32),
            grid=grid,
            in_specs=[
                act(dt), act(1), act(dp), act(dp),
                res((H, dt)), res((H, dp)), res((H, 1)), res((H, 1)),
                res((dp, H)), res((dp, H)), res((dp, 1)), res((dp, 1)),
            ],
            out_specs=pl.BlockSpec((4, dp, tb), lambda i: (0, 0, i)),
            compiler_params=pltpu.CompilerParams(
                dimension_semantics=("parallel",)),     # megacore-shard batch
        )(y_t, age_t, c_t, eps_t,
          self.w1y_t, self.w1c_t, self.w1a, self.b1,
          self.w2mu_t, self.w2ls_t, self.b2mu, self.b2ls)

        # Split + transpose back to the caller's (B, dim_param) convention.
        param = slab[0].T
        mu = slab[1].T
        sigma = slab[2].T
        log_prob = slab[3].T
        return param, mu, sigma, log_prob

    # ------------------------------------------------------------------ #
    def get_dists_params(self, y, age, cond_sample, dim_idx, seed=0):
        # TODO(synk): dim_idx selects the autoregressive dimension in concrete
        # subclasses; this synthetic head emits all dim_param heads in one call.
        # A real per-dim loop should become an extra grid axis of this same
        # pallas_call (weights stay resident, launch cost amortized).
        param, mu, sigma, _ = self._run(y, age, cond_sample, seed)
        dists = Normal(mu, sigma)
        return dists, param                     # param already the dim=1 concat

    def compute_log_prob(self, dists, params):
        # Stateless generic path, identical formula to the fused in-kernel result.
        return dists.log_prob(params)

    def forward(self, y, age, compute_log_prob, cond_sample, dim_idx, seed=0):
        param, mu, sigma, log_prob = self._run(y, age, cond_sample, seed)
        dists = Normal(mu, sigma)
        if compute_log_prob:
            return (param, dists, log_prob)     # kernel-fused log_prob
        return (param, dists)


if __name__ == "__main__":
    dim_target, dim_param, n_sample = 4, 4, 32
    model = PosteriorModel(dim_target, dim_param, n_sample, dim_hidden=32, seed=0)

    key = jax.random.PRNGKey(0)
    ky, ka, kc = jax.random.split(key, 3)
    y = jax.random.normal(ky, (n_sample, dim_target), jnp.float32)
    age = jax.random.uniform(ka, (n_sample, 1), jnp.float32)
    cond_sample = jax.random.normal(kc, (n_sample, dim_param), jnp.float32)

    param, dists, log_prob = model.forward(
        y, age, compute_log_prob=True, cond_sample=cond_sample, dim_idx=0, seed=42)
    jax.block_until_ready(param)
    jax.block_until_ready(log_prob)

    assert param.shape == (n_sample, dim_param)
    assert log_prob.shape == (n_sample, dim_param)
    assert dists.loc.shape == (n_sample, dim_param)
    assert bool(jnp.all(jnp.isfinite(param)))
    assert bool(jnp.all(jnp.isfinite(log_prob)))
    # Fused in-kernel log_prob must agree with the generic Normal formula applied
    # to the exact (mu, sigma, param) the kernel emitted.
    ref_lp = dists.log_prob(param)
    assert bool(jnp.allclose(log_prob, ref_lp, atol=1e-4, rtol=1e-4))

    # Also exercise the no-log_prob branch and the stateless compute_log_prob path.
    p2, d2 = model.forward(y, age, compute_log_prob=False,
                           cond_sample=cond_sample, dim_idx=0, seed=7)
    jax.block_until_ready(p2)
    assert p2.shape == (n_sample, dim_param)
    lp2 = model.compute_log_prob(d2, p2)
    assert bool(jnp.all(jnp.isfinite(lp2)))

    print("KERNEL_OK")
</pallas_src>

<mosaic_0001>
module attributes {stable_mosaic.version = 11 : i64} {
  func.func @_posterior_kernel(%arg0: i32, %arg1: memref<4x32xbf16, #tpu.memory_space<vmem>>, %arg2: memref<1x32xf32, #tpu.memory_space<vmem>>, %arg3: memref<4x32xbf16, #tpu.memory_space<vmem>>, %arg4: memref<4x32xf32, #tpu.memory_space<vmem>>, %arg5: memref<32x4xbf16, #tpu.memory_space<vmem>>, %arg6: memref<32x4xbf16, #tpu.memory_space<vmem>>, %arg7: memref<32x1xf32, #tpu.memory_space<vmem>>, %arg8: memref<32x1xf32, #tpu.memory_space<vmem>>, %arg9: memref<4x32xbf16, #tpu.memory_space<vmem>>, %arg10: memref<4x32xbf16, #tpu.memory_space<vmem>>, %arg11: memref<4x1xf32, #tpu.memory_space<vmem>>, %arg12: memref<4x1xf32, #tpu.memory_space<vmem>>, %arg13: memref<4x4x32xf32, #tpu.memory_space<vmem>>) attributes {dimension_semantics = [#tpu.dimension_semantics<parallel>], iteration_bounds = array<i64: 1>, scalar_prefetch = 0 : i64, scratch_operands = 0 : i64, tpu.core_type = #tpu.core_type<tc>, window_params = [{transform_indices = @transform_0, window_bounds = array<i64: 4, 32>}, {transform_indices = @transform_1, window_bounds = array<i64: 1, 32>}, {transform_indices = @transform_2, window_bounds = array<i64: 4, 32>}, {transform_indices = @transform_3, window_bounds = array<i64: 4, 32>}, {pipeline_mode = #tpu.pipeline_mode<synchronous>, transform_indices = @transform_4, window_bounds = array<i64: 32, 4>}, {pipeline_mode = #tpu.pipeline_mode<synchronous>, transform_indices = @transform_5, window_bounds = array<i64: 32, 4>}, {pipeline_mode = #tpu.pipeline_mode<synchronous>, transform_indices = @transform_6, window_bounds = array<i64: 32, 1>}, {pipeline_mode = #tpu.pipeline_mode<synchronous>, transform_indices = @transform_7, window_bounds = array<i64: 32, 1>}, {pipeline_mode = #tpu.pipeline_mode<synchronous>, transform_indices = @transform_8, window_bounds = array<i64: 4, 32>}, {pipeline_mode = #tpu.pipeline_mode<synchronous>, transform_indices = @transform_9, window_bounds = array<i64: 4, 32>}, {pipeline_mode = #tpu.pipeline_mode<synchronous>, transform_indices = @transform_10, window_bounds = array<i64: 4, 1>}, {pipeline_mode = #tpu.pipeline_mode<synchronous>, transform_indices = @transform_11, window_bounds = array<i64: 4, 1>}, {transform_indices = @transform_12, window_bounds = array<i64: 4, 4, 32>}]} {
    %c0 = arith.constant 0 : index
    %c0_0 = arith.constant 0 : index
    %0 = vector.load %arg5[%c0, %c0_0] : memref<32x4xbf16, #tpu.memory_space<vmem>>, vector<32x4xbf16>
    %c0_1 = arith.constant 0 : index
    %c0_2 = arith.constant 0 : index
    %1 = vector.load %arg1[%c0_1, %c0_2] : memref<4x32xbf16, #tpu.memory_space<vmem>>, vector<4x32xbf16>
    %cst = arith.constant dense<0.000000e+00> : vector<32x32xf32>
    %2 = tpu.matmul %0, %1, %cst {dimension_numbers = #tpu.dot_dimension_numbers<[1], [0], [0], [1], [0, 0, 1, 1], [], []>} : vector<32x4xbf16>, vector<4x32xbf16>, vector<32x32xf32> -> vector<32x32xf32>
    %c0_3 = arith.constant 0 : index
    %c0_4 = arith.constant 0 : index
    %3 = vector.load %arg6[%c0_3, %c0_4] : memref<32x4xbf16, #tpu.memory_space<vmem>>, vector<32x4xbf16>
    %c0_5 = arith.constant 0 : index
    %c0_6 = arith.constant 0 : index
    %4 = vector.load %arg3[%c0_5, %c0_6] : memref<4x32xbf16, #tpu.memory_space<vmem>>, vector<4x32xbf16>
    %cst_7 = arith.constant dense<0.000000e+00> : vector<32x32xf32>
    %5 = tpu.matmul %3, %4, %cst_7 {dimension_numbers = #tpu.dot_dimension_numbers<[1], [0], [0], [1], [0, 0, 1, 1], [], []>} : vector<32x4xbf16>, vector<4x32xbf16>, vector<32x32xf32> -> vector<32x32xf32>
    %6 = arith.addf %2, %5 : vector<32x32xf32>
    %c0_8 = arith.constant 0 : index
    %c0_9 = arith.constant 0 : index
    %7 = vector.load %arg7[%c0_8, %c0_9] : memref<32x1xf32, #tpu.memory_space<vmem>>, vector<32x1xf32>
    %c0_10 = arith.constant 0 : index
    %c0_11 = arith.constant 0 : index
    %8 = vector.load %arg2[%c0_10, %c0_11] : memref<1x32xf32, #tpu.memory_space<vmem>>, vector<1x32xf32>
    %9 = vector.broadcast %7 : vector<32x1xf32> to vector<32x32xf32>
    %10 = vector.broadcast %8 : vector<1x32xf32> to vector<32x32xf32>
    %11 = arith.mulf %9, %10 : vector<32x32xf32>
    %12 = arith.addf %6, %11 : vector<32x32xf32>
    %c0_12 = arith.constant 0 : index
    %c0_13 = arith.constant 0 : index
    %13 = vector.load %arg8[%c0_12, %c0_13] : memref<32x1xf32, #tpu.memory_space<vmem>>, vector<32x1xf32>
    %14 = vector.broadcast %13 : vector<32x1xf32> to vector<32x32xf32>
    %15 = arith.addf %12, %14 : vector<32x32xf32>
    %cst_14 = arith.constant 0.000000e+00 : f32
    %16 = vector.broadcast %cst_14 : f32 to vector<32x32xf32>
    %17 = arith.maximumf %15, %16 : vector<32x32xf32>
    %18 = arith.truncf %17 : vector<32x32xf32> to vector<32x32xbf16>
    %c0_15 = arith.constant 0 : index
    %c0_16 = arith.constant 0 : index
    %19 = vector.load %arg9[%c0_15, %c0_16] : memref<4x32xbf16, #tpu.memory_space<vmem>>, vector<4x32xbf16>
    %cst_17 = arith.constant dense<0.000000e+00> : vector<4x32xf32>
    %20 = tpu.matmul %19, %18, %cst_17 {dimension_numbers = #tpu.dot_dimension_numbers<[1], [0], [0], [1], [0, 0, 1, 1], [], []>} : vector<4x32xbf16>, vector<32x32xbf16>, vector<4x32xf32> -> vector<4x32xf32>
    %c0_18 = arith.constant 0 : index
    %c0_19 = arith.constant 0 : index
    %21 = vector.load %arg11[%c0_18, %c0_19] : memref<4x1xf32, #tpu.memory_space<vmem>>, vector<4x1xf32>
    %22 = vector.broadcast %21 : vector<4x1xf32> to vector<4x32xf32>
    %23 = arith.addf %20, %22 : vector<4x32xf32>
    %c0_20 = arith.constant 0 : index
    %c0_21 = arith.constant 0 : index
    %24 = vector.load %arg10[%c0_20, %c0_21] : memref<4x32xbf16, #tpu.memory_space<vmem>>, vector<4x32xbf16>
    %cst_22 = arith.constant dense<0.000000e+00> : vector<4x32xf32>
    %25 = tpu.matmul %24, %18, %cst_22 {dimension_numbers = #tpu.dot_dimension_numbers<[1], [0], [0], [1], [0, 0, 1, 1], [], []>} : vector<4x32xbf16>, vector<32x32xbf16>, vector<4x32xf32> -> vector<4x32xf32>
    %c0_23 = arith.constant 0 : index
    %c0_24 = arith.constant 0 : index
    %26 = vector.load %arg12[%c0_23, %c0_24] : memref<4x1xf32, #tpu.memory_space<vmem>>, vector<4x1xf32>
    %27 = vector.broadcast %26 : vector<4x1xf32> to vector<4x32xf32>
    %28 = arith.addf %25, %27 : vector<4x32xf32>
    %29 = math.exp %28 : vector<4x32xf32>
    %c0_25 = arith.constant 0 : index
    %c0_26 = arith.constant 0 : index
    %30 = vector.load %arg4[%c0_25, %c0_26] : memref<4x32xf32, #tpu.memory_space<vmem>>, vector<4x32xf32>
    %31 = arith.mulf %29, %30 : vector<4x32xf32>
    %32 = arith.addf %23, %31 : vector<4x32xf32>
    %cst_27 = arith.constant -5.000000e-01 : f32
    %33 = vector.broadcast %cst_27 : f32 to vector<4x32xf32>
    %34 = arith.mulf %33, %30 : vector<4x32xf32>
    %35 = arith.mulf %34, %30 : vector<4x32xf32>
    %36 = arith.subf %35, %28 : vector<4x32xf32>
    %cst_28 = arith.constant 0.918938517 : f32
    %37 = vector.broadcast %cst_28 : f32 to vector<4x32xf32>
    %38 = arith.subf %36, %37 : vector<4x32xf32>
    %c0_29 = arith.constant 0 : index
    %c0_30 = arith.constant 0 : index
    %c0_31 = arith.constant 0 : index
    %39 = vector.load %arg13[%c0_29, %c0_30, %c0_31] : memref<4x4x32xf32, #tpu.memory_space<vmem>>, vector<1x4x32xf32>
    %40 = vector.shape_cast %39 : vector<1x4x32xf32> to vector<4x32xf32>
    %41 = vector.shape_cast %32 : vector<4x32xf32> to vector<1x4x32xf32>
    tpu.vector_store %arg13[%c0_29, %c0_30, %c0_31], %41 {strides = array<i32>} : memref<4x4x32xf32, #tpu.memory_space<vmem>>, vector<1x4x32xf32>,
    %c1 = arith.constant 1 : index
    %c0_32 = arith.constant 0 : index
    %c0_33 = arith.constant 0 : index
    %42 = vector.load %arg13[%c1, %c0_32, %c0_33] : memref<4x4x32xf32, #tpu.memory_space<vmem>>, vector<1x4x32xf32>
    %43 = vector.shape_cast %42 : vector<1x4x32xf32> to vector<4x32xf32>
    %44 = vector.shape_cast %23 : vector<4x32xf32> to vector<1x4x32xf32>
    tpu.vector_store %arg13[%c1, %c0_32, %c0_33], %44 {strides = array<i32>} : memref<4x4x32xf32, #tpu.memory_space<vmem>>, vector<1x4x32xf32>,
    %c2 = arith.constant 2 : index
    %c0_34 = arith.constant 0 : index
    %c0_35 = arith.constant 0 : index
    %45 = vector.load %arg13[%c2, %c0_34, %c0_35] : memref<4x4x32xf32, #tpu.memory_space<vmem>>, vector<1x4x32xf32>
    %46 = vector.shape_cast %45 : vector<1x4x32xf32> to vector<4x32xf32>
    %47 = vector.shape_cast %29 : vector<4x32xf32> to vector<1x4x32xf32>
    tpu.vector_store %arg13[%c2, %c0_34, %c0_35], %47 {strides = array<i32>} : memref<4x4x32xf32, #tpu.memory_space<vmem>>, vector<1x4x32xf32>,
    %c3 = arith.constant 3 : index
    %c0_36 = arith.constant 0 : index
    %c0_37 = arith.constant 0 : index
    %48 = vector.load %arg13[%c3, %c0_36, %c0_37] : memref<4x4x32xf32, #tpu.memory_space<vmem>>, vector<1x4x32xf32>
    %49 = vector.shape_cast %48 : vector<1x4x32xf32> to vector<4x32xf32>
    %50 = vector.shape_cast %38 : vector<4x32xf32> to vector<1x4x32xf32>
    tpu.vector_store %arg13[%c3, %c0_36, %c0_37], %50 {strides = array<i32>} : memref<4x4x32xf32, #tpu.memory_space<vmem>>, vector<1x4x32xf32>,
    return
  }
  func.func @transform_0(%arg0: i32) -> (i32, i32) {
    %c0_i32 = arith.constant 0 : i32
    %c0_i32_0 = arith.constant 0 : i32
    return %c0_i32, %arg0 : i32, i32
  }
  func.func @transform_1(%arg0: i32) -> (i32, i32) {
    %c0_i32 = arith.constant 0 : i32
    %c0_i32_0 = arith.constant 0 : i32
    return %c0_i32, %arg0 : i32, i32
  }
  func.func @transform_2(%arg0: i32) -> (i32, i32) {
    %c0_i32 = arith.constant 0 : i32
    %c0_i32_0 = arith.constant 0 : i32
    return %c0_i32, %arg0 : i32, i32
  }
  func.func @transform_3(%arg0: i32) -> (i32, i32) {
    %c0_i32 = arith.constant 0 : i32
    %c0_i32_0 = arith.constant 0 : i32
    return %c0_i32, %arg0 : i32, i32
  }
  func.func @transform_4(%arg0: i32) -> (i32, i32) {
    %c0_i32 = arith.constant 0 : i32
    %c0_i32_0 = arith.constant 0 : i32
    %c0_i32_1 = arith.constant 0 : i32
    return %c0_i32, %c0_i32_0 : i32, i32
  }
  func.func @transform_5(%arg0: i32) -> (i32, i32) {
    %c0_i32 = arith.constant 0 : i32
    %c0_i32_0 = arith.constant 0 : i32
    %c0_i32_1 = arith.constant 0 : i32
    return %c0_i32, %c0_i32_0 : i32, i32
  }
  func.func @transform_6(%arg0: i32) -> (i32, i32) {
    %c0_i32 = arith.constant 0 : i32
    %c0_i32_0 = arith.constant 0 : i32
    %c0_i32_1 = arith.constant 0 : i32
    return %c0_i32, %c0_i32_0 : i32, i32
  }
  func.func @transform_7(%arg0: i32) -> (i32, i32) {
    %c0_i32 = arith.constant 0 : i32
    %c0_i32_0 = arith.constant 0 : i32
    %c0_i32_1 = arith.constant 0 : i32
    return %c0_i32, %c0_i32_0 : i32, i32
  }
  func.func @transform_8(%arg0: i32) -> (i32, i32) {
    %c0_i32 = arith.constant 0 : i32
    %c0_i32_0 = arith.constant 0 : i32
    %c0_i32_1 = arith.constant 0 : i32
    return %c0_i32, %c0_i32_0 : i32, i32
  }
  func.func @transform_9(%arg0: i32) -> (i32, i32) {
    %c0_i32 = arith.constant 0 : i32
    %c0_i32_0 = arith.constant 0 : i32
    %c0_i32_1 = arith.constant 0 : i32
    return %c0_i32, %c0_i32_0 : i32, i32
  }
  func.func @transform_10(%arg0: i32) -> (i32, i32) {
    %c0_i32 = arith.constant 0 : i32
    %c0_i32_0 = arith.constant 0 : i32
    %c0_i32_1 = arith.constant 0 : i32
    return %c0_i32, %c0_i32_0 : i32, i32
  }
  func.func @transform_11(%arg0: i32) -> (i32, i32) {
    %c0_i32 = arith.constant 0 : i32
    %c0_i32_0 = arith.constant 0 : i32
    %c0_i32_1 = arith.constant 0 : i32
    return %c0_i32, %c0_i32_0 : i32, i32
  }
  func.func @transform_12(%arg0: i32) -> (i32, i32, i32) {
    %c0_i32 = arith.constant 0 : i32
    %c0_i32_0 = arith.constant 0 : i32
    %c0_i32_1 = arith.constant 0 : i32
    return %c0_i32, %c0_i32_0, %arg0 : i32, i32, i32
  }
}

</mosaic_0001>

<bundles_post_ra>
// kernel: tpu_custom_call.1
= control target key start
LH: loop header
LB: loop body
LE: loop exit
PB: predicated region body
PF: predicated region fallthrough
CT: control target
= control target key end

     0   :  { %vm70_vm0 = vcmask 1041408   ;;  %vm63_vm1 = vcmask 31744   ;;  %v494_v7 = vmov 0   ;;  %s647_s0 = inlined_call_operand.vmem [shape: bf16[4,32], index: 0, kind: input, shape index: {}]   ;;  %s648_s1 = inlined_call_operand.vmem [shape: f32[1,32], index: 1, kind: input, shape index: {}]   ;;  %s649_s2 = inlined_call_operand.vmem [shape: bf16[4,32], index: 2, kind: input, shape index: {}]   ;;  %s650_s3 = inlined_call_operand.vmem [shape: f32[4,32], index: 3, kind: input, shape index: {}]   ;;  %s651_s4 = inlined_call_operand.vmem [shape: bf16[32,4], index: 4, kind: input, shape index: {}]   ;;  %s652_s5 = inlined_call_operand.vmem [shape: bf16[32,4], index: 5, kind: input, shape index: {}]   ;;  %s653_s6 = inlined_call_operand.vmem [shape: f32[32,1], index: 6, kind: input, shape index: {}]   ;;  %s654_s7 = inlined_call_operand.vmem [shape: f32[32,1], index: 7, kind: input, shape index: {}]   ;;  %s655_s8 = inlined_call_operand.vmem [shape: bf16[4,32], index: 8, kind: input, shape index: {}]   ;;  %s656_s9 = inlined_call_operand.vmem [shape: bf16[4,32], index: 9, kind: input, shape index: {}]   ;;  %s657_s10 = inlined_call_operand.vmem [shape: f32[4,1], index: 10, kind: input, shape index: {}]   ;;  %s658_s11 = inlined_call_operand.vmem [shape: f32[4,1], index: 11, kind: input, shape index: {}]   ;;  %s659_s12 = inlined_call_operand.hbm [shape: f32[4,4,32], index: 12, kind: output, shape index: {}]  }
   0x1   :  { %v52_v0 = vld [vmem:[%s649_s2] sm:$0x3]  ;;  %v465_v3 = vld [vmem:[%s652_s5 + $0x8] sm:$0xff]   ;;  %463 = vset.pattern.permute.xlu1 %v494_v7  ;;  %462 = vset.pattern.permute.xlu0 %v494_v7  ;;  %v193_v8 = vld [vmem:[%s653_s6 + $0x10] sm:$0xff] }
   0x2   :  { %v464_v1 = vld [vmem:[%s652_s5] sm:$0xff]   ;;  %454 = vmatprep.subr.msk.bf16.mxu0 %vm70_vm0, %v52_v0  ;;  %v72_v2 = vsel %vm70_vm0, %v52_v0, 0  ;;  %208 = vperm.xlu1 %463, %v193_v8   ;;  %v194_v10 = vld [vmem:[%s653_s6 + $0x18] sm:$0xff]  ;;  %v192_v11 = vld [vmem:[%s653_s6 + $0x8] sm:$0xff] }
   0x3   :  { %423 = vmatpush3.bf16.msra.mxu0 %v72_v2  ;;  %424 = vmatprep.mubr.msk.bf16.mxu0 %vm63_vm1, %v464_v1  ;;  %v47_v4 = vld [vmem:[%s647_s0] sm:$0x3] }
   0x4   :  { %455 = vmatprep.subr.msk.bf16.mxu0 %vm70_vm0, %v47_v4  ;;  %v140_v5 = vsel %vm70_vm0, %v47_v4, 0  ;;  %v466_v6 = vld [vmem:[%s651_s4] sm:$0xff]  }
   0x5   :  { %v191_v9 = vld [vmem:[%s653_s6] sm:$0xff] }
   0x6   :  { %425 = vmatmul.mubr.msk.bf16.vlgmr.msra.gmra.mrb[0].mxu0 %vm63_vm1, %v465_v3  ;;  %198 = vperm.xlu0 %462, %v191_v9  }
   0x7   :  { %429 = vmatpush3.bf16.msra.mxu0 %v140_v5  ;;  %430 = vmatprep.mubr.msk.bf16.mxu0 %vm63_vm1, %v466_v6 }
   0x8   :  { %17 = vsyncpa [#allocation3], 0  ;;  %213 = vperm.xlu1 %463, %v194_v10   ;;  %v231_v12 = vld [vmem:[%s654_s7 + $0x8] sm:$0xff]  ;;  %v230_v13 = vld [vmem:[%s654_s7] sm:$0xff]  ;;  %v495_v19 = vmov 0.0   ;;  %vm496_vm2 = vmmov 0  }
   0x9   :  { %v467_v14 = vld [vmem:[%s651_s4 + $0x8] sm:$0xff]   ;;  %v233_v15 = vld [vmem:[%s654_s7 + $0x18] sm:$0xff]  ;;  %v232_v16 = vld [vmem:[%s654_s7 + $0x10] sm:$0xff]  ;;  %434 = vmatprep.subr.bf16.mxu1 %v495_v19  ;;  %438 = vmatprep.mubr.msk.bf16.mxu1 %vm496_vm2, %v495_v19  ;;  %vm271_vm3 = vcmask 261120   ;;  %vm374_vm4 = vcmask 257024  }
   0xa   :  { %203 = vperm.xlu0 %462, %v192_v11   ;;  %v265_v17 = vld [vmem:[%s657_s10] sm:$0xf] }
   0xb   :  { %v316_v18 = vld [vmem:[%s658_s11] sm:$0xf] }
   0xc   :  { %241 = vperm.xlu1 %463, %v231_v12   ;;  %v406_v24 = vld [vmem:[%s648_s1] ss:$0 sm:$0xff] }
   0xd   :  { %v264_v51 = vld [vmem:[%s655_s8] sm:$0x3] }
   0xe   :  { %236 = vperm.xlu0 %462, %v230_v13   ;;  %v315_v52 = vld [vmem:[%s656_s9] sm:$0x3] }
   0xf   :  { %v367_v55 = vld [vmem:[%s650_s3] sm:$0xf]  ;;  %s497_s3 = smov [#allocation2]  }
  0x10   :  { %251 = vperm.xlu1 %463, %v233_v15   ;;  %v370_v60 = vmul.f32 -0.5, %v367_v55  ;;  %s387_s8 = sshll.u32 %s497_s3, 4  ;;  %s388_s8 = int_to_ptr.vmem [resolvable:$true] %s387_s8 }
  0x11   :  { %s470_s9 = scalar_lea.vmem %s388_s8, 256  ;;  %p475_p1 = scmp.lt.s32.totalorder %s388_s8, %s388_s8 }
  0x12   :  { %431 = vmatmul.mubr.msk.bf16.vlgmr.msra.gmra.mrb[0].mxu0 %vm63_vm1, %v467_v14  ;;  %246 = vperm.xlu0 %462, %v232_v16   ;;  %v371_v61 = vmul.f32 %v370_v60, %v367_v55  ;;  %p471_p0 = scmp.ne.s32.totalorder %s388_s8, %s470_s9  ;;  %p476_p2 = scmp.lt.s32.totalorder %s470_s9, %s470_s9 }
  0x14   :  { %268 = vperm.xlu1 %463, %v265_v17   ;;  %p477_p3 = por %p476_p2, %p475_p1 }
  0x16   :  { %319 = vperm.xlu0 %462, %v316_v18   ;;  %p478_p4 = pnand %p477_p3, %p471_p0 }
  0x81   :  { %v209_v21 = vpop.permute.xlu1 %208 }
  0x82   :  { %v224_v26 = vmul.f32 %v406_v24, %v209_v21 }
  0x85   :  { %v199_v20 = vpop.permute.xlu0 %198 }
  0x86   :  { %v222_v28 = vmul.f32 %v406_v24, %v199_v20 }
  0x87   :  { %v214_v23 = vpop.permute.xlu1 %213 }
  0x88   :  { %v225_v30 = vmul.f32 %v406_v24, %v214_v23 }
  0x89   :  { %v204_v22 = vpop.permute.xlu0 %203 }
  0x8a   :  { %v223_v33 = vmul.f32 %v406_v24, %v204_v22 }
  0x8b   :  { %v242_v27 = vpop.permute.xlu1 %241 }
  0x8d   :  { %v237_v25 = vpop.permute.xlu0 %236 }
  0x8f   :  { %v252_v40 = vpop.permute.xlu1 %251 }
  0x91   :  { %v247_v34 = vpop.permute.xlu0 %246 }
  0x93   :  { %v269_v53 = vpop.permute.xlu1 %268 }
  0x95   :  { %v320_v62 = vpop.permute.xlu0 %319 }
  0xe5   :  { %v432_v29 = vpop.f32.mrb[0].mxu0 }
  0xe6   :  { %v228_v31 = vadd.f32 %v432_v29, %v224_v26  ;;  %v176_v32 = vpop.f32.mrb[1].mxu0 }
  0xe7   :  { %v226_v35 = vadd.f32 %v222_v28, %v176_v32  ;;  %v433_v36 = vpop.f32.mrb[2].mxu0 }
  0xe8   :  { %v256_v37 = vadd.f32 %v247_v34, %v228_v31  ;;  %v229_v38 = vadd.f32 %v433_v36, %v225_v30  ;;  %v179_v39 = vpop.f32.mrb[3].mxu0 }
  0xe9   :  { %v254_v41 = vadd.f32 %v237_v25, %v226_v35  ;;  %v227_v42 = vadd.f32 %v223_v33, %v179_v39 }
  0xea   :  { %v257_v43 = vadd.f32 %v252_v40, %v229_v38  ;;  %v260_v45 = vmax.f32 %v256_v37, 0.0 }
  0xeb   :  { %v255_v44 = vadd.f32 %v242_v27, %v227_v42  ;;  %v258_v47 = vmax.f32 %v254_v41, 0.0 }
  0xec   :  { %v261_v46 = vmax.f32 %v257_v43, 0.0 }
  0xed   :  { %v259_v48 = vmax.f32 %v255_v44, 0.0 }
  0xee   :  { %v263_v49 = vpack.c.bf16 %v261_v46, %v260_v45 }
  0xef   :  { %v262_v50 = vpack.c.bf16 %v259_v48, %v258_v47 }
  0xf1   :  { %435 = vmatpush3.bf16.msra.mxu1 %v262_v50 }
  0xf2   :  { %436 = vmatprep.subr.bf16.mxu1 %v495_v19 }
  0xf5   :  { %437 = vmatpush3.bf16.msra.mxu1 %v263_v49 }
  0xf6   :  { %442 = vmatprep.subr.bf16.mxu1 %v495_v19 }
  0xf8   :  { %439 = vmatmul.mubr.msk.bf16.vlgmr.msra.gmra.mrb[0].mxu1 %vm271_vm3, %v264_v51 }
  0xf9   :  { %443 = vmatpush3.bf16.msra.mxu1 %v262_v50  ;;  %446 = vmatprep.mubr.msk.bf16.mxu1 %vm496_vm2, %v495_v19 }
  0xfa   :  { %444 = vmatprep.subr.bf16.mxu1 %v495_v19 }
  0xfd   :  { %445 = vmatpush3.bf16.msra.mxu1 %v263_v49 }
 0x100   :  { %447 = vmatmul.mubr.msk.bf16.vlgmr.msra.gmra.mrb[4].mxu1 %vm271_vm3, %v315_v52 }
 0x1cb   :  { %v309_v54 = vpop.f32.mrb[0].mxu1 }
 0x1cc   :  { %v310_v56 = vadd.f32 %v309_v54, %v269_v53  ;;  %v440_v57 = vpop.f32.mrb[1].mxu1 }
 0x1cd   :  { %v312_v58 = vpop.f32.mrb[2].mxu1 }
 0x1ce   :  { %377 = vst.msk [vmem:[#allocation2 + $0x4] sm:$0xf] %vm374_vm4, %v310_v56  ;;  %v441_v59 = vpop.f32.mrb[3].mxu1 }
 0x1d3   :  { %v359_v63 = vpop.f32.mrb[4].mxu1 }
 0x1d4   :  { %v360_v0 = vadd.f32 %v359_v63, %v320_v62  ;;  %v448_v1 = vpop.f32.mrb[5].mxu1 }
 0x1d5   :  { %v362_v2 = vpop.f32.mrb[6].mxu1 }
 0x1d6   :  { %v365_v3 = vmul.f32 1.442695, %v360_v0  ;;  %v372_v4 = vsub.f32 %v371_v61, %v360_v0  ;;  %v449_v5 = vpop.f32.mrb[7].mxu1 }
 0x1d8   :  { %468 = vpow2.f32 %v365_v3  ;;  %v409_v6 = vadd.f32 -0.9189385, %v372_v4 }
 0x1da   :  { %381 = vst.msk [vmem:[#allocation2 + $0xc] sm:$0xf] %vm374_vm4, %v409_v6 }
 0x1e2   :  { %v469_v7 = vpop.eup %468 }
 0x1e3   :  { %v368_v8 = vmul.f32 %v469_v7, %v367_v55  ;;  %379 = vst.msk [vmem:[#allocation2 + $0x8] sm:$0xf] %vm374_vm4, %v469_v7 }
 0x1e5   :  { %v369_v9 = vadd.f32 %v368_v8, %v310_v56 }
 0x1e7   :  { %375 = vst.msk [vmem:[#allocation2] sm:$0xf] %vm374_vm4, %v369_v9 }
 0x1e8   :  { %481 = shalt.err (!%p478_p4)
}
 0x1e9   :  { %s482_s15 = scalar_lea.hbm %s659_s12, 256 }
 0x1ea   :  { %p483_p5 = scmp.ne.s32.totalorder %s659_s12, %s482_s15  ;;  %p486_p6 = scmp.lt.u32.totalorder %s482_s15, %s659_s12 }
 0x1ec   :  { %p488_p7 = pnand %p486_p6, %p483_p5 }
 0x1ee   :  { %491 = shalt.err (!%p488_p7)
}
 0x1ef   :  { %s498_s20 = smov 64   ;;  %s499_s21 = smov 4  }
 0x1f0   :  { %393 = dma.vmem_to_hbm [thread:$0]  %s388_s8, 256, %s659_s12, [#allocation3], %s498_s20, %s498_s20, %s499_s21  }
 0x1f1   :  { %492 = dma.done.wait [#allocation3], 256  }
 0x1f2   :  { %493 = vsyncadd [#allocation3], 4294967040 }
 0x1f3   :  { %397 = vsyncpa [#allocation3], 1 }

</bundles_post_ra>
